<compile_context>
chip_gen: v5e
topology: v5e:2x2
jax: 0.10.0
libtpu: 0.0.40
codegen_flags: <defaults>
</compile_context>

<pallas_src>
import math

import jax
import jax.numpy as jnp
from jax.experimental import pallas as pl
from jax.experimental.pallas import tpu as pltpu


def _gcn_fused_kernel(adj_ref, x_ref, w_ref, out_ref):
    # (TM, N) @ (N, Fi) -> (TM, Fi), then (TM, Fi) @ (Fi, Fo) -> (TM, Fo)
    ax = jnp.dot(adj_ref[...], x_ref[...], preferred_element_type=jnp.float32)
    out = jnp.dot(ax, w_ref[...], preferred_element_type=jnp.float32)
    out_ref[...] = out.astype(out_ref.dtype)


def _spmm_kernel(adj_ref, s_ref, out_ref):
    # (TM, N) @ (N, Fo) -> (TM, Fo)
    out = jnp.dot(adj_ref[...], s_ref[...], preferred_element_type=jnp.float32)
    out_ref[...] = out.astype(out_ref.dtype)


def _xw_kernel(x_ref, w_ref, s_ref):
    # (TM, Fi) @ (Fi, Fo) -> (TM, Fo)
    s = jnp.dot(x_ref[...], w_ref[...], preferred_element_type=jnp.float32)
    s_ref[...] = s.astype(s_ref.dtype)


def _round_up(v, m):
    return ((v + m - 1) // m) * m


def _pad2d(a, rows, cols):
    return jnp.pad(a, ((0, rows - a.shape[0]), (0, cols - a.shape[1])))


@jax.jit
def graph_convolution4(x, adj, weight):
    """x: (N, F_in), adj: (N, N), weight: (F_in, F_out) -> (N, F_out)."""
    n, f_in = x.shape
    f_out = weight.shape[1]
    assert adj.shape == (n, n)
    assert weight.shape[0] == f_in

    fi_pad = _round_up(f_in, 128)
    fo_pad = _round_up(f_out, 128)

    # Row-tile size for the streamed adj / output tiles.
    n_lane = _round_up(n, 128)
    tm = min(256, n_lane)
    # Keep the double-buffered adj row slabs within ~16 MiB so the full
    # working set (adj tiles + resident x/W/support + out tiles) stays under
    # the 32 MiB scoped-VMEM cap requested below.
    while tm > 128 and 2 * tm * n_lane * 4 > (16 << 20):
        tm //= 2
    # TODO(synk): for graphs beyond ~16k nodes add a K grid axis over adj
    # columns with a float32 VMEM accumulator (pl.when init / writeback)
    # instead of holding full-width adj rows.
    n_pad = _round_up(n, tm)  # tm is a multiple of 128 -> columns lane-aligned too

    adj_p = _pad2d(adj, n_pad, n_pad)
    x_p = _pad2d(x, n_pad, fi_pad)
    w_p = _pad2d(weight, fi_pad, fo_pad)

    grid = (n_pad // tm,)
    cparams = pltpu.CompilerParams(
        dimension_semantics=("parallel",),   # lets v7x shard rows over its 2 TCs
        vmem_limit_bytes=32 * 1024 * 1024,
    )

    if f_in <= f_out:
        # (adj @ x) @ W — re-associated; the N^2 matmul contracts over the
        # smaller feature dim, and x/W stay resident across all row tiles.
        out_p = pl.pallas_call(
            _gcn_fused_kernel,
            out_shape=jax.ShapeDtypeStruct((n_pad, fo_pad), x.dtype),
            grid=grid,
            in_specs=[
                pl.BlockSpec((tm, n_pad), lambda i: (i, 0)),       # streamed
                pl.BlockSpec((n_pad, fi_pad), lambda i: (0, 0)),   # resident
                pl.BlockSpec((fi_pad, fo_pad), lambda i: (0, 0)),  # resident
            ],
            out_specs=pl.BlockSpec((tm, fo_pad), lambda i: (i, 0)),
            compiler_params=cparams,
        )(adj_p, x_p, w_p)
    else:
        # support = x @ W computed once (hoisted out of the adj row loop) ...
        support_p = pl.pallas_call(
            _xw_kernel,
            out_shape=jax.ShapeDtypeStruct((n_pad, fo_pad), x.dtype),
            grid=grid,
            in_specs=[
                pl.BlockSpec((tm, fi_pad), lambda i: (i, 0)),
                pl.BlockSpec((fi_pad, fo_pad), lambda i: (0, 0)),
            ],
            out_specs=pl.BlockSpec((tm, fo_pad), lambda i: (i, 0)),
            compiler_params=cparams,
        )(x_p, w_p)
        # ... then adj @ support streamed over row tiles.
        out_p = pl.pallas_call(
            _spmm_kernel,
            out_shape=jax.ShapeDtypeStruct((n_pad, fo_pad), x.dtype),
            grid=grid,
            in_specs=[
                pl.BlockSpec((tm, n_pad), lambda i: (i, 0)),       # streamed
                pl.BlockSpec((n_pad, fo_pad), lambda i: (0, 0)),   # resident
            ],
            out_specs=pl.BlockSpec((tm, fo_pad), lambda i: (i, 0)),
            compiler_params=cparams,
        )(adj_p, support_p)

    return out_p[:n, :f_out]


def init_params(key, in_features, out_features):
    """Deterministic init mirroring reset_parameters(): U(-stdv, stdv)."""
    stdv = 1.0 / math.sqrt(out_features)
    k_w, k_b = jax.random.split(key)
    weight = jax.random.uniform(
        k_w, (in_features, out_features), jnp.float32, minval=-stdv, maxval=stdv
    )
    # bias is defined in __init__ but unused in forward.
    bias = jax.random.uniform(
        k_b, (out_features,), jnp.float32, minval=-stdv, maxval=stdv
    )
    return weight, bias


if __name__ == "__main__":
    key = jax.random.PRNGKey(0)
    k_x, k_adj, k_p, k_x2, k_p2 = jax.random.split(key, 5)

    # Config 1: F_in < F_out -> fused (adj @ x) @ W path.
    # N=300 pads to 512 with TM=256 -> exercises a 2-step row grid + padding.
    N, F_IN, F_OUT = 300, 16, 32
    x = jax.random.normal(k_x, (N, F_IN), jnp.float32)
    adj = jax.random.normal(k_adj, (N, N), jnp.float32)
    weight, _bias = init_params(k_p, F_IN, F_OUT)

    out = jax.block_until_ready(graph_convolution4(x, adj, weight))
    ref = jnp.dot(adj, jnp.dot(x, weight, precision="highest"), precision="highest")
    assert out.shape == (N, F_OUT)
    assert jnp.allclose(out, ref, atol=1e-2, rtol=1e-2), float(
        jnp.max(jnp.abs(out - ref))
    )

    # Config 2: F_in > F_out -> hoisted support = x @ W path.
    N2, F_IN2, F_OUT2 = 300, 64, 16
    x2 = jax.random.normal(k_x2, (N2, F_IN2), jnp.float32)
    weight2, _bias2 = init_params(k_p2, F_IN2, F_OUT2)
    out2 = jax.block_until_ready(graph_convolution4(x2, adj, weight2))
    ref2 = jnp.dot(adj, jnp.dot(x2, weight2, precision="highest"), precision="highest")
    assert out2.shape == (N2, F_OUT2)
    assert jnp.allclose(out2, ref2, atol=1e-2, rtol=1e-2), float(
        jnp.max(jnp.abs(out2 - ref2))
    )

    print("KERNEL_OK")
</pallas_src>

<mosaic_0001>
module attributes {stable_mosaic.version = 11 : i64} {
  func.func @_gcn_fused_kernel(%arg0: i32, %arg1: memref<256x512xf32, #tpu.memory_space<vmem>>, %arg2: memref<512x128xf32, #tpu.memory_space<vmem>>, %arg3: memref<128x128xf32, #tpu.memory_space<vmem>>, %arg4: memref<256x128xf32, #tpu.memory_space<vmem>>) attributes {dimension_semantics = [#tpu.dimension_semantics<parallel>], iteration_bounds = array<i64: 2>, scalar_prefetch = 0 : i64, scratch_operands = 0 : i64, tpu.core_type = #tpu.core_type<tc>, window_params = [{transform_indices = @transform_0, window_bounds = array<i64: 256, 512>}, {pipeline_mode = #tpu.pipeline_mode<synchronous>, transform_indices = @transform_1, window_bounds = array<i64: 512, 128>}, {pipeline_mode = #tpu.pipeline_mode<synchronous>, transform_indices = @transform_2, window_bounds = array<i64: 128, 128>}, {transform_indices = @transform_3, window_bounds = array<i64: 256, 128>}]} {
    %c0 = arith.constant 0 : index
    %c0_0 = arith.constant 0 : index
    %0 = vector.load %arg1[%c0, %c0_0] : memref<256x512xf32, #tpu.memory_space<vmem>>, vector<256x512xf32>
    %c0_1 = arith.constant 0 : index
    %c0_2 = arith.constant 0 : index
    %1 = vector.load %arg2[%c0_1, %c0_2] : memref<512x128xf32, #tpu.memory_space<vmem>>, vector<512x128xf32>
    %cst = arith.constant dense<0.000000e+00> : vector<256x128xf32>
    %2 = tpu.matmul %0, %1, %cst {dimension_numbers = #tpu.dot_dimension_numbers<[1], [0], [0], [1], [0, 0, 1, 1], [], []>} : vector<256x512xf32>, vector<512x128xf32>, vector<256x128xf32> -> vector<256x128xf32>
    %c0_3 = arith.constant 0 : index
    %c0_4 = arith.constant 0 : index
    %3 = vector.load %arg3[%c0_3, %c0_4] : memref<128x128xf32, #tpu.memory_space<vmem>>, vector<128x128xf32>
    %cst_5 = arith.constant dense<0.000000e+00> : vector<256x128xf32>
    %4 = tpu.matmul %2, %3, %cst_5 {dimension_numbers = #tpu.dot_dimension_numbers<[1], [0], [0], [1], [0, 0, 1, 1], [], []>} : vector<256x128xf32>, vector<128x128xf32>, vector<256x128xf32> -> vector<256x128xf32>
    %c0_6 = arith.constant 0 : index
    %c0_7 = arith.constant 0 : index
    %5 = vector.load %arg4[%c0_6, %c0_7] : memref<256x128xf32, #tpu.memory_space<vmem>>, vector<256x128xf32>
    tpu.vector_store %arg4[%c0_6, %c0_7], %4 {strides = array<i32>} : memref<256x128xf32, #tpu.memory_space<vmem>>, vector<256x128xf32>,
    return
  }
  func.func @transform_0(%arg0: i32) -> (i32, i32) {
    %c0_i32 = arith.constant 0 : i32
    %c0_i32_0 = arith.constant 0 : i32
    return %arg0, %c0_i32 : i32, i32
  }
  func.func @transform_1(%arg0: i32) -> (i32, i32) {
    %c0_i32 = arith.constant 0 : i32
    %c0_i32_0 = arith.constant 0 : i32
    %c0_i32_1 = arith.constant 0 : i32
    return %c0_i32, %c0_i32_0 : i32, i32
  }
  func.func @transform_2(%arg0: i32) -> (i32, i32) {
    %c0_i32 = arith.constant 0 : i32
    %c0_i32_0 = arith.constant 0 : i32
    %c0_i32_1 = arith.constant 0 : i32
    return %c0_i32, %c0_i32_0 : i32, i32
  }
  func.func @transform_3(%arg0: i32) -> (i32, i32) {
    %c0_i32 = arith.constant 0 : i32
    %c0_i32_0 = arith.constant 0 : i32
    return %arg0, %c0_i32 : i32, i32
  }
}

</mosaic_0001>

<bundles_post_ra>
// kernel: graph_convolution4.1
= control target key start
LH: loop header
LB: loop body
LE: loop exit
PB: predicated region body
PF: predicated region fallthrough
CT: control target
= control target key end

     0   :  { %s1135_s12 = smov 0   ;;  %s1634_s0 = inlined_call_operand.vmem [shape: f32[512,512], index: 0, kind: input, shape index: {}]   ;;  %s1635_s1 = inlined_call_operand.vmem [shape: f32[512,128], index: 1, kind: input, shape index: {}]   ;;  %s1636_s2 = inlined_call_operand.vmem [shape: f32[128,128], index: 2, kind: input, shape index: {}]   ;;  %s1637_s3 = inlined_call_operand.vmem [shape: f32[512,128], index: 3, kind: output, shape index: {}]  }
   0x1 LB: > { %s1038_s13 = sadd.s32 4294967295, %s1113_s12   ;;  %p1042_p0 = scmp.ge.s32.totalorder %s1113_s12, 1  ;;  %s1113_s12 = sphi %s1135_s12, %s13_s12  }
   0x2   : > { %p139_p1 = scmp.lt.s32.totalorder %s1113_s12, 3 }
   0x4   : > { %p140_p2 = pnand %p1042_p0, %p139_p1 }
   0x5   : > { %s1043_s30 = sshll.u32 (!%p140_p2), %s1038_s13, 5 }
   0x6   : > { %143 = sbr.rel (%p140_p2) target bundleno = 619 (0x26b), region = 32  ;;  %p165_p3 = scmp.lt.s32.totalorder (!%p140_p2), %s1043_s30, 63 }
   0xb   : > { %v320_v0 = vld [vmem:[%s1635_s1 + $0x78] sm:$0xff]  ;;  %v319_v1 = vld [vmem:[%s1635_s1 + $0x70] sm:$0xff]  ;;  %v318_v2 = vld [vmem:[%s1635_s1 + $0x68] sm:$0xff]  ;;  %s1639_s30 = smov (!%p165_p3, %s1043_s30), 63 }
   0xc   : > { %1051 = vmatpush.msra.mxu1 %v320_v0  ;;  %1052 = vmatpush.msra.mxu2 %v320_v0  ;;  %v317_v3 = vld [vmem:[%s1635_s1 + $0x60] sm:$0xff]  ;;  %v316_v4 = vld [vmem:[%s1635_s1 + $0x58] sm:$0xff]  ;;  %v315_v5 = vld [vmem:[%s1635_s1 + $0x50] sm:$0xff]  ;;  %s1050_s15 = sshll.u32 %s1639_s30, 5  ;;  %s1047_s7 = sshll.u32 %s1639_s30, 3 }
   0xd   : > { %1053 = vmatpush.msra.mxu3 %v320_v0  ;;  %369 = vmatpush.msra.mxu0 %v320_v0  ;;  %v314_v6 = vld [vmem:[%s1635_s1 + $0x48] sm:$0xff]  ;;  %v313_v7 = vld [vmem:[%s1635_s1 + $0x40] sm:$0xff]  ;;  %v312_v8 = vld [vmem:[%s1635_s1 + $0x38] sm:$0xff]  ;;  %s1196_s22 = scalar_lea.vmem %s1634_s0, %s1050_s15 }
   0xe   : > { %1054 = vmatpush.msra.mxu1 %v319_v1  ;;  %1055 = vmatpush.msra.mxu2 %v319_v1  ;;  %v311_v9 = vld [vmem:[%s1635_s1 + $0x30] sm:$0xff]  ;;  %v310_v10 = vld [vmem:[%s1635_s1 + $0x28] sm:$0xff]  ;;  %v309_v11 = vld [vmem:[%s1635_s1 + $0x20] sm:$0xff] }
   0xf   : > { %1056 = vmatpush.msra.mxu3 %v319_v1  ;;  %370 = vmatpush.msra.mxu0 %v319_v1  ;;  %v308_v12 = vld [vmem:[%s1635_s1 + $0x18] sm:$0xff]  ;;  %v307_v13 = vld [vmem:[%s1635_s1 + $0x10] sm:$0xff]  ;;  %v306_v14 = vld [vmem:[%s1635_s1 + $0x8] sm:$0xff] }
  0x10   : > { %1057 = vmatpush.msra.mxu1 %v318_v2  ;;  %1058 = vmatpush.msra.mxu2 %v318_v2  ;;  %v305_v15 = vld [vmem:[%s1635_s1] sm:$0xff]  ;;  %v352_v18 = vld [vmem:[%s1635_s1 + $0x178] sm:$0xff]  ;;  %v351_v22 = vld [vmem:[%s1635_s1 + $0x170] sm:$0xff] }
  0x11   : > { %1059 = vmatpush.msra.mxu3 %v318_v2  ;;  %371 = vmatpush.msra.mxu0 %v318_v2  ;;  %v209_v16 = vld [vmem:[%s1196_s22 + $0x100] sm:$0xff]  ;;  %v336_v20 = vld [vmem:[%s1635_s1 + $0xf8] sm:$0xff]  ;;  %v335_v23 = vld [vmem:[%s1635_s1 + $0xf0] sm:$0xff] }
  0x12   : > { %1060 = vmatpush.msra.mxu1 %v317_v3  ;;  %1061 = vmatpush.msra.mxu2 %v317_v3  ;;  %v241_v17 = vld [vmem:[%s1196_s22 + $0x200] sm:$0xff]  ;;  %v368_v21 = vld [vmem:[%s1635_s1 + $0x1f8] sm:$0xff]  ;;  %v367_v24 = vld [vmem:[%s1635_s1 + $0x1f0] sm:$0xff] }
  0x13   : > { %1062 = vmatpush.msra.mxu3 %v317_v3  ;;  %372 = vmatpush.msra.mxu0 %v317_v3  ;;  %v273_v19 = vld [vmem:[%s1196_s22 + $0x300] sm:$0xff]  ;;  %v350_v25 = vld [vmem:[%s1635_s1 + $0x168] sm:$0xff]  ;;  %v348_v34 = vld [vmem:[%s1635_s1 + $0x158] sm:$0xff] }
  0x14   : > { %1063 = vmatpush.msra.mxu1 %v316_v4  ;;  %1064 = vmatpush.msra.mxu2 %v316_v4  ;;  %v334_v26 = vld [vmem:[%s1635_s1 + $0xe8] sm:$0xff]  ;;  %v349_v28 = vld [vmem:[%s1635_s1 + $0x160] sm:$0xff]  ;;  %v364_v35 = vld [vmem:[%s1635_s1 + $0x1d8] sm:$0xff] }
  0x15   : > { %1065 = vmatpush.msra.mxu3 %v316_v4  ;;  %373 = vmatpush.msra.mxu0 %v316_v4  ;;  %v366_v27 = vld [vmem:[%s1635_s1 + $0x1e8] sm:$0xff]  ;;  %v213_v29 = vld [vmem:[%s1196_s22 + $0x120] sm:$0xff]  ;;  %v332_v36 = vld [vmem:[%s1635_s1 + $0xd8] sm:$0xff] }
  0x16   : > { %1066 = vmatpush.msra.mxu1 %v315_v5  ;;  %1067 = vmatpush.msra.mxu2 %v315_v5  ;;  %v245_v30 = vld [vmem:[%s1196_s22 + $0x220] sm:$0xff]  ;;  %v347_v37 = vld [vmem:[%s1635_s1 + $0x150] sm:$0xff]  ;;  %v346_v40 = vld [vmem:[%s1635_s1 + $0x148] sm:$0xff] }
  0x17   : > { %1068 = vmatpush.msra.mxu3 %v315_v5  ;;  %374 = vmatpush.msra.mxu0 %v315_v5  ;;  %v365_v31 = vld [vmem:[%s1635_s1 + $0x1e0] sm:$0xff]  ;;  %v363_v38 = vld [vmem:[%s1635_s1 + $0x1d0] sm:$0xff]  ;;  %v362_v41 = vld [vmem:[%s1635_s1 + $0x1c8] sm:$0xff] }
  0x18   : > { %1069 = vmatpush.msra.mxu1 %v314_v6  ;;  %1070 = vmatpush.msra.mxu2 %v314_v6  ;;  %v333_v32 = vld [vmem:[%s1635_s1 + $0xe0] sm:$0xff]  ;;  %v331_v39 = vld [vmem:[%s1635_s1 + $0xd0] sm:$0xff]  ;;  %v330_v42 = vld [vmem:[%s1635_s1 + $0xc8] sm:$0xff] }
  0x19   : > { %1071 = vmatpush.msra.mxu3 %v314_v6  ;;  %375 = vmatpush.msra.mxu0 %v314_v6  ;;  %v277_v33 = vld [vmem:[%s1196_s22 + $0x320] sm:$0xff]  ;;  %v344_v49 = vld [vmem:[%s1635_s1 + $0x138] sm:$0xff]  ;;  %v343_v52 = vld [vmem:[%s1635_s1 + $0x130] sm:$0xff] }
  0x1a   : > { %1072 = vmatpush.msra.mxu1 %v313_v7  ;;  %1073 = vmatpush.msra.mxu2 %v313_v7  ;;  %v217_v43 = vld [vmem:[%s1196_s22 + $0x140] sm:$0xff]  ;;  %v360_v50 = vld [vmem:[%s1635_s1 + $0x1b8] sm:$0xff]  ;;  %v359_v53 = vld [vmem:[%s1635_s1 + $0x1b0] sm:$0xff] }
  0x1b   : > { %1074 = vmatpush.msra.mxu3 %v313_v7  ;;  %376 = vmatpush.msra.mxu0 %v313_v7  ;;  %v249_v44 = vld [vmem:[%s1196_s22 + $0x240] sm:$0xff]  ;;  %v328_v51 = vld [vmem:[%s1635_s1 + $0xb8] sm:$0xff]  ;;  %v327_v54 = vld [vmem:[%s1635_s1 + $0xb0] sm:$0xff] }
  0x1c   : > { %1075 = vmatpush.msra.mxu1 %v312_v8  ;;  %1076 = vmatpush.msra.mxu2 %v312_v8  ;;  %v345_v45 = vld [vmem:[%s1635_s1 + $0x140] sm:$0xff]  ;;  %v342_v55 = vld [vmem:[%s1635_s1 + $0x128] sm:$0xff]  ;;  %v340_v0 = vld [vmem:[%s1635_s1 + $0x118] sm:$0xff] }
  0x1d   : > { %1077 = vmatpush.msra.mxu3 %v312_v8  ;;  %377 = vmatpush.msra.mxu0 %v312_v8  ;;  %v361_v46 = vld [vmem:[%s1635_s1 + $0x1c0] sm:$0xff]  ;;  %v358_v56 = vld [vmem:[%s1635_s1 + $0x1a8] sm:$0xff]  ;;  %v356_v1 = vld [vmem:[%s1635_s1 + $0x198] sm:$0xff] }
  0x1e   : > { %1078 = vmatpush.msra.mxu1 %v311_v9  ;;  %1079 = vmatpush.msra.mxu2 %v311_v9  ;;  %v281_v47 = vld [vmem:[%s1196_s22 + $0x340] sm:$0xff]  ;;  %v326_v59 = vld [vmem:[%s1635_s1 + $0xa8] sm:$0xff]  ;;  %v324_v2 = vld [vmem:[%s1635_s1 + $0x98] sm:$0xff] }
  0x1f   : > { %1080 = vmatpush.msra.mxu3 %v311_v9  ;;  %378 = vmatpush.msra.mxu0 %v311_v9  ;;  %v329_v48 = vld [vmem:[%s1635_s1 + $0xc0] sm:$0xff]  ;;  %v339_v3 = vld [vmem:[%s1635_s1 + $0x110] sm:$0xff]  ;;  %v338_v8 = vld [vmem:[%s1635_s1 + $0x108] sm:$0xff] }
  0x20   : > { %1081 = vmatpush.msra.mxu1 %v310_v10  ;;  %1082 = vmatpush.msra.mxu2 %v310_v10  ;;  %v221_v57 = vld [vmem:[%s1196_s22 + $0x160] sm:$0xff]  ;;  %v355_v4 = vld [vmem:[%s1635_s1 + $0x190] sm:$0xff]  ;;  %v354_v9 = vld [vmem:[%s1635_s1 + $0x188] sm:$0xff] }
  0x21   : > { %1083 = vmatpush.msra.mxu3 %v310_v10  ;;  %379 = vmatpush.msra.mxu0 %v310_v10  ;;  %v253_v58 = vld [vmem:[%s1196_s22 + $0x260] sm:$0xff]  ;;  %v323_v5 = vld [vmem:[%s1635_s1 + $0x90] sm:$0xff] }
  0x22   : > { %1084 = vmatpush.msra.mxu1 %v309_v11  ;;  %1085 = vmatpush.msra.mxu2 %v309_v11  ;;  %v341_v60 = vld [vmem:[%s1635_s1 + $0x120] sm:$0xff] }
  0x23   : > { %1086 = vmatpush.msra.mxu3 %v309_v11  ;;  %380 = vmatpush.msra.mxu0 %v309_v11  ;;  %v285_v61 = vld [vmem:[%s1196_s22 + $0x360] sm:$0xff]  ;;  %v322_v11 = vld [vmem:[%s1635_s1 + $0x88] sm:$0xff] }
  0x24   : > { %1087 = vmatpush.msra.mxu1 %v308_v12  ;;  %1088 = vmatpush.msra.mxu2 %v308_v12  ;;  %v357_v62 = vld [vmem:[%s1635_s1 + $0x1a0] sm:$0xff] }
  0x25   : > { %1089 = vmatpush.msra.mxu3 %v308_v12  ;;  %381 = vmatpush.msra.mxu0 %v308_v12  ;;  %v325_v63 = vld [vmem:[%s1635_s1 + $0xa0] sm:$0xff] }
  0x26   : > { %1090 = vmatpush.msra.mxu1 %v307_v13  ;;  %1091 = vmatpush.msra.mxu2 %v307_v13  ;;  %v225_v6 = vld [vmem:[%s1196_s22 + $0x180] sm:$0xff] }
  0x27   : > { %1092 = vmatpush.msra.mxu3 %v307_v13  ;;  %382 = vmatpush.msra.mxu0 %v307_v13  ;;  %v257_v7 = vld [vmem:[%s1196_s22 + $0x280] sm:$0xff] }
  0x28   : > { %1093 = vmatpush.msra.mxu1 %v306_v14  ;;  %1094 = vmatpush.msra.mxu2 %v306_v14  ;;  %v289_v10 = vld [vmem:[%s1196_s22 + $0x380] sm:$0xff] }
  0x29   : > { %1095 = vmatpush.msra.mxu3 %v306_v14  ;;  %383 = vmatpush.msra.mxu0 %v306_v14  ;;  %v337_v12 = vld [vmem:[%s1635_s1 + $0x100] sm:$0xff] }
  0x2a   : > { %1096 = vmatpush.msra.mxu1 %v305_v15  ;;  %1097 = vmatpush.msra.mxu2 %v305_v15  ;;  %v353_v13 = vld [vmem:[%s1635_s1 + $0x180] sm:$0xff] }
  0x2b   : > { %409 = vmatmul.f32.vlgmr.msra.gmra.mxu1 %v209_v16  ;;  %433 = vmatmul.f32.vlgmr.msra.gmra.mxu2 %v241_v17  ;;  %v321_v14 = vld [vmem:[%s1635_s1 + $0x80] sm:$0xff] }
  0x2c   : > { %595 = vmatpush.msrb.mxu2 %v352_v18  ;;  %1098 = vmatpush.msra.mxu3 %v305_v15  ;;  %v229_v16 = vld [vmem:[%s1196_s22 + $0x1a0] sm:$0xff] }
  0x2d   : > { %457 = vmatmul.f32.vlgmr.msra.gmra.mxu3 %v273_v19  ;;  %482 = vmatpush.msrb.mxu1 %v336_v20  ;;  %v261_v17 = vld [vmem:[%s1196_s22 + $0x2a0] sm:$0xff] }
  0x2e   : > { %708 = vmatpush.msrb.mxu3 %v368_v21  ;;  %596 = vmatpush.msrb.mxu2 %v351_v22  ;;  %v293_v18 = vld [vmem:[%s1196_s22 + $0x3a0] sm:$0xff] }
  0x2f   : > { %483 = vmatpush.msrb.mxu1 %v335_v23  ;;  %384 = vmatpush.msra.mxu0 %v305_v15  ;;  %v177_v15 = vld [vmem:[%s1196_s22] sm:$0xff] }
  0x30   : > { %709 = vmatpush.msrb.mxu3 %v367_v24  ;;  %597 = vmatpush.msrb.mxu2 %v350_v25  ;;  %v181_v19 = vld [vmem:[%s1196_s22 + $0x20] sm:$0xff] }
  0x31   : > { %484 = vmatpush.msrb.mxu1 %v334_v26  ;;  %385 = vmatmul.f32.vlgmr.msra.gmra.mxu0 %v177_v15  ;;  %v233_v20 = vld [vmem:[%s1196_s22 + $0x1c0] sm:$0xff]  ;;  %v218_v15 = vld [vmem:[%s1196_s22 + $0x148] sm:$0xff] }
  0x32   : > { %710 = vmatpush.msrb.mxu3 %v366_v27  ;;  %598 = vmatpush.msrb.mxu2 %v349_v28  ;;  %v265_v21 = vld [vmem:[%s1196_s22 + $0x2c0] sm:$0xff]  ;;  %v178_v28 = vld [vmem:[%s1196_s22 + $0x8] sm:$0xff] }
  0x33   : > { %412 = vmatmul.f32.gmra.mxu1 %v213_v29  ;;  %436 = vmatmul.f32.gmra.mxu2 %v245_v30  ;;  %v297_v22 = vld [vmem:[%s1196_s22 + $0x3c0] sm:$0xff]  ;;  %v179_v29 = vld [vmem:[%s1196_s22 + $0x10] sm:$0xff]  ;;  %v180_v30 = vld [vmem:[%s1196_s22 + $0x18] sm:$0xff] }
  0x34   : > { %711 = vmatpush.msrb.mxu3 %v365_v31  ;;  %485 = vmatpush.msrb.mxu1 %v333_v32  ;;  %v185_v23 = vld [vmem:[%s1196_s22 + $0x40] sm:$0xff]  ;;  %v182_v32 = vld [vmem:[%s1196_s22 + $0x28] sm:$0xff] }
  0x35   : > { %460 = vmatmul.f32.gmra.mxu3 %v277_v33  ;;  %599 = vmatpush.msrb.mxu2 %v348_v34  ;;  %v237_v24 = vld [vmem:[%s1196_s22 + $0x1e0] sm:$0xff]  ;;  %v183_v33 = vld [vmem:[%s1196_s22 + $0x30] sm:$0xff]  ;;  %v184_v34 = vld [vmem:[%s1196_s22 + $0x38] sm:$0xff] }
  0x36   : > { %712 = vmatpush.msrb.mxu3 %v364_v35  ;;  %486 = vmatpush.msrb.mxu1 %v332_v36  ;;  %v269_v25 = vld [vmem:[%s1196_s22 + $0x2e0] sm:$0xff]  ;;  %v186_v36 = vld [vmem:[%s1196_s22 + $0x48] sm:$0xff] }
  0x37   : > { %600 = vmatpush.msrb.mxu2 %v347_v37  ;;  %v301_v26 = vld [vmem:[%s1196_s22 + $0x3e0] sm:$0xff]  ;;  %v187_v37 = vld [vmem:[%s1196_s22 + $0x50] sm:$0xff] }
  0x38   : > { %713 = vmatpush.msrb.mxu3 %v363_v38  ;;  %487 = vmatpush.msrb.mxu1 %v331_v39  ;;  %v189_v27 = vld [vmem:[%s1196_s22 + $0x60] sm:$0xff]  ;;  %v188_v38 = vld [vmem:[%s1196_s22 + $0x58] sm:$0xff] }
  0x39   : > { %601 = vmatpush.msrb.mxu2 %v346_v40  ;;  %388 = vmatmul.f32.gmra.mxu0 %v181_v19  ;;  %v193_v31 = vld [vmem:[%s1196_s22 + $0x80] sm:$0xff]  ;;  %v190_v40 = vld [vmem:[%s1196_s22 + $0x68] sm:$0xff] }
  0x3a   : > { %714 = vmatpush.msrb.mxu3 %v362_v41  ;;  %488 = vmatpush.msrb.mxu1 %v330_v42  ;;  %v197_v35 = vld [vmem:[%s1196_s22 + $0xa0] sm:$0xff]  ;;  %v191_v41 = vld [vmem:[%s1196_s22 + $0x70] sm:$0xff]  ;;  %v192_v42 = vld [vmem:[%s1196_s22 + $0x78] sm:$0xff] }
  0x3b   : > { %415 = vmatmul.f32.gmra.mxu1 %v217_v43  ;;  %439 = vmatmul.f32.gmra.mxu2 %v249_v44  ;;  %v201_v39 = vld [vmem:[%s1196_s22 + $0xc0] sm:$0xff]  ;;  %v194_v44 = vld [vmem:[%s1196_s22 + $0x88] sm:$0xff] }
  0x3c   : > { %602 = vmatpush.msrb.mxu2 %v345_v45  ;;  %715 = vmatpush.msrb.mxu3 %v361_v46  ;;  %v205_v43 = vld [vmem:[%s1196_s22 + $0xe0] sm:$0xff]  ;;  %v195_v45 = vld [vmem:[%s1196_s22 + $0x90] sm:$0xff]  ;;  %v196_v46 = vld [vmem:[%s1196_s22 + $0x98] sm:$0xff] }
  0x3d   : > { %463 = vmatmul.f32.gmra.mxu3 %v281_v47  ;;  %489 = vmatpush.msrb.mxu1 %v329_v48  ;;  %v198_v47 = vld [vmem:[%s1196_s22 + $0xa8] sm:$0xff]  ;;  %v199_v48 = vld [vmem:[%s1196_s22 + $0xb0] sm:$0xff] }
  0x3e   : > { %603 = vmatpush.msrb.mxu2 %v344_v49  ;;  %716 = vmatpush.msrb.mxu3 %v360_v50  ;;  %v200_v49 = vld [vmem:[%s1196_s22 + $0xb8] sm:$0xff] }
  0x3f   : > { %490 = vmatpush.msrb.mxu1 %v328_v51  ;;  %v836_v50 = vld [vmem:[%s1636_s2 + $0x78] sm:$0xff]  ;;  %v835_v51 = vld [vmem:[%s1636_s2 + $0x70] sm:$0xff] }
  0x40   : > { %604 = vmatpush.msrb.mxu2 %v343_v52  ;;  %717 = vmatpush.msrb.mxu3 %v359_v53  ;;  %v202_v52 = vld [vmem:[%s1196_s22 + $0xc8] sm:$0xff]  ;;  %v203_v53 = vld [vmem:[%s1196_s22 + $0xd0] sm:$0xff] }
  0x41   : > { %491 = vmatpush.msrb.mxu1 %v327_v54  ;;  %391 = vmatmul.f32.gmra.mxu0 %v185_v23  ;;  %v204_v54 = vld [vmem:[%s1196_s22 + $0xd8] sm:$0xff]  ;;  %v222_v23 = vld [vmem:[%s1196_s22 + $0x168] sm:$0xff] }
  0x42   : > { %605 = vmatpush.msrb.mxu2 %v342_v55  ;;  %718 = vmatpush.msrb.mxu3 %v358_v56  ;;  %v834_v55 = vld [vmem:[%s1636_s2 + $0x68] sm:$0xff]  ;;  %v833_v56 = vld [vmem:[%s1636_s2 + $0x60] sm:$0xff] }
  0x43   : > { %418 = vmatmul.f32.gmra.mxu1 %v221_v57  ;;  %442 = vmatmul.f32.gmra.mxu2 %v253_v58  ;;  %v206_v57 = vld [vmem:[%s1196_s22 + $0xe8] sm:$0xff]  ;;  %v207_v58 = vld [vmem:[%s1196_s22 + $0xf0] sm:$0xff] }
  0x44   : > { %492 = vmatpush.msrb.mxu1 %v326_v59  ;;  %606 = vmatpush.msrb.mxu2 %v341_v60  ;;  %v208_v59 = vld [vmem:[%s1196_s22 + $0xf8] sm:$0xff] }
  0x45   : > { %466 = vmatmul.f32.gmra.mxu3 %v285_v61  ;;  %837 = vmatpush.msrb.mxu0 %v836_v50  ;;  %v832_v60 = vld [vmem:[%s1636_s2 + $0x58] sm:$0xff]  ;;  %v831_v61 = vld [vmem:[%s1636_s2 + $0x50] sm:$0xff] }
  0x46   : > { %719 = vmatpush.msrb.mxu3 %v357_v62  ;;  %493 = vmatpush.msrb.mxu1 %v325_v63  ;;  %v210_v63 = vld [vmem:[%s1196_s22 + $0x108] sm:$0xff] }
  0x47   : > { %607 = vmatpush.msrb.mxu2 %v340_v0  ;;  %838 = vmatpush.msrb.mxu0 %v835_v51  ;;  %v211_v0 = vld [vmem:[%s1196_s22 + $0x110] sm:$0xff] }
  0x48   : > { %720 = vmatpush.msrb.mxu3 %v356_v1  ;;  %494 = vmatpush.msrb.mxu1 %v324_v2  ;;  %v212_v1 = vld [vmem:[%s1196_s22 + $0x118] sm:$0xff]  ;;  %v830_v2 = vld [vmem:[%s1636_s2 + $0x48] sm:$0xff] }
  0x49   : > { %608 = vmatpush.msrb.mxu2 %v339_v3  ;;  %394 = vmatmul.f32.gmra.mxu0 %v189_v27 }
  0x4a   : > { %721 = vmatpush.msrb.mxu3 %v355_v4  ;;  %495 = vmatpush.msrb.mxu1 %v323_v5  ;;  %v829_v4 = vld [vmem:[%s1636_s2 + $0x40] sm:$0xff] }
  0x4b   : > { %421 = vmatmul.f32.gmra.mxu1 %v225_v6  ;;  %445 = vmatmul.f32.gmra.mxu2 %v257_v7  ;;  %v214_v7 = vld [vmem:[%s1196_s22 + $0x128] sm:$0xff] }
  0x4c   : > { %609 = vmatpush.msrb.mxu2 %v338_v8  ;;  %722 = vmatpush.msrb.mxu3 %v354_v9  ;;  %v215_v8 = vld [vmem:[%s1196_s22 + $0x130] sm:$0xff]  ;;  %v216_v9 = vld [vmem:[%s1196_s22 + $0x138] sm:$0xff] }
  0x4d   : > { %469 = vmatmul.f32.gmra.mxu3 %v289_v10  ;;  %496 = vmatpush.msrb.mxu1 %v322_v11  ;;  %v828_v10 = vld [vmem:[%s1636_s2 + $0x38] sm:$0xff] }
  0x4e   : > { %610 = vmatpush.msrb.mxu2 %v337_v12  ;;  %723 = vmatpush.msrb.mxu3 %v353_v13  ;;  %v827_v12 = vld [vmem:[%s1636_s2 + $0x30] sm:$0xff] }
  0x4f   : > { %497 = vmatpush.msrb.mxu1 %v321_v14  ;;  %839 = vmatpush.msrb.mxu0 %v834_v55 }
  0x51   : > { %397 = vmatmul.f32.gmra.mxu0 %v193_v31  ;;  %v226_v31 = vld [vmem:[%s1196_s22 + $0x188] sm:$0xff] }
  0x52   : > { %840 = vmatpush.msrb.mxu0 %v833_v56 }
  0x53   : > { %424 = vmatmul.f32.gmra.mxu1 %v229_v16  ;;  %448 = vmatmul.f32.gmra.mxu2 %v261_v17  ;;  %v219_v16 = vld [vmem:[%s1196_s22 + $0x150] sm:$0xff]  ;;  %v220_v17 = vld [vmem:[%s1196_s22 + $0x158] sm:$0xff] }
  0x54   : > { %841 = vmatpush.msrb.mxu0 %v832_v60  ;;  %v243_v60 = vld [vmem:[%s1196_s22 + $0x210] sm:$0xff] }
  0x55   : > { %472 = vmatmul.f32.gmra.mxu3 %v293_v18  ;;  %v826_v18 = vld [vmem:[%s1636_s2 + $0x28] sm:$0xff] }
  0x56   : > { %842 = vmatpush.msrb.mxu0 %v831_v61  ;;  %v244_v61 = vld [vmem:[%s1196_s22 + $0x218] sm:$0xff] }
  0x58   : > { %843 = vmatpush.msrb.mxu0 %v830_v2 }
  0x59   : > { %400 = vmatmul.f32.gmra.mxu0 %v197_v35 }
  0x5a   : > { %844 = vmatpush.msrb.mxu0 %v829_v4 }
  0x5b   : > { %427 = vmatmul.f32.gmra.mxu1 %v233_v20  ;;  %451 = vmatmul.f32.gmra.mxu2 %v265_v21  ;;  %v825_v20 = vld [vmem:[%s1636_s2 + $0x20] sm:$0xff] }
  0x5c   : > { %845 = vmatpush.msrb.mxu0 %v828_v10 }
  0x5d   : > { %475 = vmatmul.f32.gmra.mxu3 %v297_v22 }
  0x5e   : > { %846 = vmatpush.msrb.mxu0 %v827_v12  ;;  %v248_v12 = vld [vmem:[%s1196_s22 + $0x238] sm:$0xff] }
  0x60   : > { %847 = vmatpush.msrb.mxu0 %v826_v18 }
  0x61   : > { %403 = vmatmul.f32.gmra.mxu0 %v201_v39  ;;  %v230_v39 = vld [vmem:[%s1196_s22 + $0x1a8] sm:$0xff] }
  0x62   : > { %848 = vmatpush.msrb.mxu0 %v825_v20 }
  0x63   : > { %430 = vmatmul.f32.gmra.mxu1 %v237_v24  ;;  %454 = vmatmul.f32.gmra.mxu2 %v269_v25  ;;  %v223_v24 = vld [vmem:[%s1196_s22 + $0x170] sm:$0xff]  ;;  %v224_v25 = vld [vmem:[%s1196_s22 + $0x178] sm:$0xff] }
  0x65   : > { %478 = vmatmul.f32.gmra.mxu3 %v301_v26  ;;  %v824_v26 = vld [vmem:[%s1636_s2 + $0x18] sm:$0xff] }
  0x66   : > { %849 = vmatpush.msrb.mxu0 %v824_v26 }
  0x69   : > { %406 = vmatmul.f32.gmra.mxu0 %v205_v43 }
  0x6b   : > { %498 = vmatmul.f32.vlgmr.msrb.gmra.mxu1 %v178_v28  ;;  %611 = vmatmul.f32.vlgmr.msrb.gmra.mxu2 %v179_v29  ;;  %v823_v28 = vld [vmem:[%s1636_s2 + $0x10] sm:$0xff] }
  0x6c   : > { %850 = vmatpush.msrb.mxu0 %v823_v28  ;;  %v252_v28 = vld [vmem:[%s1196_s22 + $0x258] sm:$0xff] }
  0x6d   : > { %724 = vmatmul.f32.vlgmr.msrb.gmra.mxu3 %v180_v30 }
  0x73   : > { %501 = vmatmul.f32.gmra.mxu1 %v182_v32  ;;  %614 = vmatmul.f32.gmra.mxu2 %v183_v33  ;;  %v227_v32 = vld [vmem:[%s1196_s22 + $0x190] sm:$0xff]  ;;  %v228_v33 = vld [vmem:[%s1196_s22 + $0x198] sm:$0xff] }
  0x75   : > { %727 = vmatmul.f32.gmra.mxu3 %v184_v34  ;;  %v822_v34 = vld [vmem:[%s1636_s2 + $0x8] sm:$0xff] }
  0x76   : > { %851 = vmatpush.msrb.mxu0 %v822_v34 }
  0x7b   : > { %504 = vmatmul.f32.gmra.mxu1 %v186_v36  ;;  %617 = vmatmul.f32.gmra.mxu2 %v187_v37  ;;  %v821_v36 = vld [vmem:[%s1636_s2] sm:$0xff] }
  0x7c   : > { %852 = vmatpush.msrb.mxu0 %v821_v36 }
  0x7d   : > { %730 = vmatmul.f32.gmra.mxu3 %v188_v38 }
  0x83   : > { %507 = vmatmul.f32.gmra.mxu1 %v190_v40  ;;  %620 = vmatmul.f32.gmra.mxu2 %v191_v41  ;;  %v231_v40 = vld [vmem:[%s1196_s22 + $0x1b0] sm:$0xff]  ;;  %v232_v41 = vld [vmem:[%s1196_s22 + $0x1b8] sm:$0xff] }
  0x85   : > { %733 = vmatmul.f32.gmra.mxu3 %v192_v42 }
  0x8b   : > { %510 = vmatmul.f32.gmra.mxu1 %v194_v44  ;;  %623 = vmatmul.f32.gmra.mxu2 %v195_v45  ;;  %v234_v45 = vld [vmem:[%s1196_s22 + $0x1c8] sm:$0xff] }
  0x8d   : > { %736 = vmatmul.f32.gmra.mxu3 %v196_v46  ;;  %v235_v46 = vld [vmem:[%s1196_s22 + $0x1d0] sm:$0xff] }
  0x93   : > { %513 = vmatmul.f32.gmra.mxu1 %v198_v47  ;;  %626 = vmatmul.f32.gmra.mxu2 %v199_v48  ;;  %v236_v48 = vld [vmem:[%s1196_s22 + $0x1d8] sm:$0xff] }
  0x95   : > { %739 = vmatmul.f32.gmra.mxu3 %v200_v49 }
  0x9b   : > { %516 = vmatmul.f32.gmra.mxu1 %v202_v52  ;;  %629 = vmatmul.f32.gmra.mxu2 %v203_v53  ;;  %v238_v52 = vld [vmem:[%s1196_s22 + $0x1e8] sm:$0xff]  ;;  %v239_v53 = vld [vmem:[%s1196_s22 + $0x1f0] sm:$0xff] }
  0x9d   : > { %742 = vmatmul.f32.gmra.mxu3 %v204_v54  ;;  %v240_v54 = vld [vmem:[%s1196_s22 + $0x1f8] sm:$0xff] }
  0xa3   : > { %519 = vmatmul.f32.gmra.mxu1 %v206_v57  ;;  %632 = vmatmul.f32.gmra.mxu2 %v207_v58 }
  0xa5   : > { %745 = vmatmul.f32.gmra.mxu3 %v208_v59  ;;  %v242_v59 = vld [vmem:[%s1196_s22 + $0x208] sm:$0xff] }
  0xa8   : > { %v1419_v62 = vpop.f32.mrf.mxu1 }
  0xab   : > { %522 = vmatmul.f32.gmra.mxu1 %v210_v63  ;;  %635 = vmatmul.f32.gmra.mxu2 %v211_v0 }
  0xad   : > { %748 = vmatmul.f32.gmra.mxu3 %v212_v1 }
  0xae   : > { %v1427_v3 = vpop.f32.mrf.mxu2  ;;  %v386_v47 = vpop.f32.mrf.mxu0 }
  0xb0   : > { %v1432_v5 = vpop.f32.mrf.mxu1  ;;  %v1434_v6 = vpop.f32.mrf.mxu3 }
  0xb3   : > { %525 = vmatmul.f32.gmra.mxu1 %v214_v7  ;;  %638 = vmatmul.f32.gmra.mxu2 %v215_v8  ;;  %v246_v8 = vld [vmem:[%s1196_s22 + $0x228] sm:$0xff] }
  0xb5   : > { %751 = vmatmul.f32.gmra.mxu3 %v216_v9  ;;  %v247_v9 = vld [vmem:[%s1196_s22 + $0x230] sm:$0xff] }
  0xb6   : > { %v1442_v11 = vpop.f32.mrf.mxu2  ;;  %v389_v55 = vpop.f32.mrf.mxu0 }
  0xb8   : > { %v1447_v13 = vpop.f32.mrf.mxu1  ;;  %v1449_v14 = vpop.f32.mrf.mxu3 }
  0xbb   : > { %528 = vmatmul.f32.gmra.mxu1 %v218_v15  ;;  %641 = vmatmul.f32.gmra.mxu2 %v219_v16 }
  0xbd   : > { %754 = vmatmul.f32.gmra.mxu3 %v220_v17 }
  0xbe   : > { %v1457_v19 = vpop.f32.mrf.mxu2  ;;  %v392_v0 = vpop.f32.mrf.mxu0 }
  0xc0   : > { %v1462_v21 = vpop.f32.mrf.mxu1  ;;  %v1464_v22 = vpop.f32.mrf.mxu3 }
  0xc3   : > { %531 = vmatmul.f32.gmra.mxu1 %v222_v23  ;;  %644 = vmatmul.f32.gmra.mxu2 %v223_v24  ;;  %v250_v24 = vld [vmem:[%s1196_s22 + $0x248] sm:$0xff] }
  0xc5   : > { %757 = vmatmul.f32.gmra.mxu3 %v224_v25  ;;  %v251_v25 = vld [vmem:[%s1196_s22 + $0x250] sm:$0xff] }
  0xc6   : > { %v1472_v27 = vpop.f32.mrf.mxu2  ;;  %v395_v18 = vpop.f32.mrf.mxu0 }
  0xc8   : > { %v1477_v29 = vpop.f32.mrf.mxu1  ;;  %v1479_v30 = vpop.f32.mrf.mxu3 }
  0xcb   : > { %534 = vmatmul.f32.gmra.mxu1 %v226_v31  ;;  %647 = vmatmul.f32.gmra.mxu2 %v227_v32 }
  0xcd   : > { %760 = vmatmul.f32.gmra.mxu3 %v228_v33 }
  0xce   : > { %v1487_v35 = vpop.f32.mrf.mxu2 }
  0xd0   : > { %v1492_v37 = vpop.f32.mrf.mxu1  ;;  %v1494_v38 = vpop.f32.mrf.mxu3 }
  0xd3   : > { %537 = vmatmul.f32.gmra.mxu1 %v230_v39  ;;  %650 = vmatmul.f32.gmra.mxu2 %v231_v40  ;;  %v254_v39 = vld [vmem:[%s1196_s22 + $0x268] sm:$0xff]  ;;  %v255_v40 = vld [vmem:[%s1196_s22 + $0x270] sm:$0xff] }
  0xd5   : > { %763 = vmatmul.f32.gmra.mxu3 %v232_v41 }
  0xd6   : > { %v1499_v42 = vpop.f32.mrf.mxu2 }
  0xd8   : > { %v1501_v43 = vpop.f32.mrf.mxu1  ;;  %v1503_v44 = vpop.f32.mrf.mxu3 }
  0xdb   : > { %540 = vmatmul.f32.gmra.mxu1 %v234_v45  ;;  %653 = vmatmul.f32.gmra.mxu2 %v235_v46  ;;  %v398_v45 = vpop.f32.mrf.mxu0  ;;  %v256_v46 = vld [vmem:[%s1196_s22 + $0x278] sm:$0xff] }
  0xdd   : > { %766 = vmatmul.f32.gmra.mxu3 %v236_v48 }
  0xde   : > { %v1508_v49 = vpop.f32.mrf.mxu2 }
  0xe0   : > { %v1510_v50 = vpop.f32.mrf.mxu1  ;;  %v1512_v51 = vpop.f32.mrf.mxu3 }
  0xe3   : > { %543 = vmatmul.f32.gmra.mxu1 %v238_v52  ;;  %656 = vmatmul.f32.gmra.mxu2 %v239_v53 }
  0xe5   : > { %769 = vmatmul.f32.gmra.mxu3 %v240_v54 }
  0xe6   : > { %v1517_v56 = vpop.f32.mrf.mxu2 }
  0xe8   : > { %v1519_v57 = vpop.f32.mrf.mxu3  ;;  %v499_v58 = vpop.f32.mrf.mxu1 }
  0xe9   : > { %v500_v63 = vadd.f32 %v499_v58, %v386_v47  ;;  %v259_v58 = vld [vmem:[%s1196_s22 + $0x290] sm:$0xff] }
  0xeb   : > { %546 = vmatmul.f32.gmra.mxu1 %v242_v59  ;;  %659 = vmatmul.f32.gmra.mxu2 %v243_v60  ;;  %v260_v60 = vld [vmem:[%s1196_s22 + $0x298] sm:$0xff] }
  0xed   : > { %772 = vmatmul.f32.gmra.mxu3 %v244_v61 }
  0xee   : > { %v612_v1 = vpop.f32.mrf.mxu2 }
  0xef   : > { %v613_v2 = vadd.f32 %v612_v1, %v500_v63  ;;  %v401_v63 = vpop.f32.mrf.mxu0 }
  0xf0   : > { %v502_v4 = vpop.f32.mrf.mxu1  ;;  %v725_v7 = vpop.f32.mrf.mxu3 }
  0xf1   : > { %v726_v10 = vadd.f32 %v725_v7, %v613_v2  ;;  %v503_v15 = vadd.f32 %v502_v4, %v389_v55  ;;  %v258_v55 = vld [vmem:[%s1196_s22 + $0x288] sm:$0xff] }
  0xf2   : > { %v262_v7 = vld [vmem:[%s1196_s22 + $0x2a8] sm:$0xff] }
  0xf3   : > { %549 = vmatmul.f32.gmra.mxu1 %v246_v8  ;;  %662 = vmatmul.f32.gmra.mxu2 %v247_v9  ;;  %v263_v8 = vld [vmem:[%s1196_s22 + $0x2b0] sm:$0xff] }
  0xf4   : > { %853 = vmatmul.f32.vlgmr.msrb.gmra.mxu0 %v726_v10  ;;  %v264_v10 = vld [vmem:[%s1196_s22 + $0x2b8] sm:$0xff] }
  0xf5   : > { %775 = vmatmul.f32.gmra.mxu3 %v248_v12 }
  0xf6   : > { %v615_v16 = vpop.f32.mrf.mxu2 }
  0xf7   : > { %v616_v17 = vadd.f32 %v615_v16, %v503_v15  ;;  %v404_v15 = vpop.f32.mrf.mxu0 }
  0xf8   : > { %v505_v20 = vpop.f32.mrf.mxu1  ;;  %v728_v23 = vpop.f32.mrf.mxu3 }
  0xf9   : > { %v729_v26 = vadd.f32 %v728_v23, %v616_v17  ;;  %v506_v31 = vadd.f32 %v505_v20, %v392_v0  ;;  %v266_v23 = vld [vmem:[%s1196_s22 + $0x2c8] sm:$0xff] }
  0xfb   : > { %552 = vmatmul.f32.gmra.mxu1 %v250_v24  ;;  %665 = vmatmul.f32.gmra.mxu2 %v251_v25  ;;  %v267_v24 = vld [vmem:[%s1196_s22 + $0x2d0] sm:$0xff] }
  0xfc   : > { %856 = vmatmul.f32.gmra.mxu0 %v729_v26  ;;  %v268_v26 = vld [vmem:[%s1196_s22 + $0x2d8] sm:$0xff] }
  0xfd   : > { %778 = vmatmul.f32.gmra.mxu3 %v252_v28 }
  0xfe   : > { %v618_v32 = vpop.f32.mrf.mxu2 }
  0xff   : > { %v619_v33 = vadd.f32 %v618_v32, %v506_v31 }
 0x100   : > { %v508_v34 = vpop.f32.mrf.mxu1  ;;  %v731_v36 = vpop.f32.mrf.mxu3 }
 0x101   : > { %v732_v41 = vadd.f32 %v731_v36, %v619_v33  ;;  %v509_v47 = vadd.f32 %v508_v34, %v395_v18  ;;  %v407_v33 = vpop.f32.mrf.mxu0 }
 0x103   : > { %555 = vmatmul.f32.gmra.mxu1 %v254_v39  ;;  %668 = vmatmul.f32.gmra.mxu2 %v255_v40  ;;  %v270_v39 = vld [vmem:[%s1196_s22 + $0x2e8] sm:$0xff]  ;;  %v271_v40 = vld [vmem:[%s1196_s22 + $0x2f0] sm:$0xff] }
 0x104   : > { %859 = vmatmul.f32.gmra.mxu0 %v732_v41 }
 0x105   : > { %781 = vmatmul.f32.gmra.mxu3 %v256_v46 }
 0x106   : > { %v621_v48 = vpop.f32.mrf.mxu2 }
 0x107   : > { %v622_v52 = vadd.f32 %v621_v48, %v509_v47 }
 0x108   : > { %v511_v53 = vpop.f32.mrf.mxu1  ;;  %v734_v54 = vpop.f32.mrf.mxu3 }
 0x109   : > { %v735_v59 = vadd.f32 %v734_v54, %v622_v52  ;;  %v512_v61 = vadd.f32 %v511_v53, %v398_v45  ;;  %v272_v45 = vld [vmem:[%s1196_s22 + $0x2f8] sm:$0xff]  ;;  %v274_v54 = vld [vmem:[%s1196_s22 + $0x308] sm:$0xff] }
 0x10b   : > { %558 = vmatmul.f32.gmra.mxu1 %v258_v55  ;;  %671 = vmatmul.f32.gmra.mxu2 %v259_v58  ;;  %v275_v55 = vld [vmem:[%s1196_s22 + $0x310] sm:$0xff] }
 0x10c   : > { %862 = vmatmul.f32.gmra.mxu0 %v735_v59  ;;  %v276_v59 = vld [vmem:[%s1196_s22 + $0x318] sm:$0xff] }
 0x10d   : > { %784 = vmatmul.f32.gmra.mxu3 %v260_v60 }
 0x10e   : > { %v624_v0 = vpop.f32.mrf.mxu2 }
 0x10f   : > { %v625_v1 = vadd.f32 %v624_v0, %v512_v61 }
 0x110   : > { %v514_v2 = vpop.f32.mrf.mxu1  ;;  %v737_v4 = vpop.f32.mrf.mxu3 }
 0x111   : > { %v738_v9 = vadd.f32 %v737_v4, %v625_v1  ;;  %v515_v12 = vadd.f32 %v514_v2, %v401_v63  ;;  %v278_v2 = vld [vmem:[%s1196_s22 + $0x328] sm:$0xff]  ;;  %v279_v4 = vld [vmem:[%s1196_s22 + $0x330] sm:$0xff] }
 0x113   : > { %561 = vmatmul.f32.gmra.mxu1 %v262_v7  ;;  %674 = vmatmul.f32.gmra.mxu2 %v263_v8  ;;  %v280_v8 = vld [vmem:[%s1196_s22 + $0x338] sm:$0xff] }
 0x114   : > { %865 = vmatmul.f32.gmra.mxu0 %v738_v9 }
 0x115   : > { %787 = vmatmul.f32.gmra.mxu3 %v264_v10 }
 0x116   : > { %v627_v16 = vpop.f32.mrf.mxu2 }
 0x117   : > { %v628_v17 = vadd.f32 %v627_v16, %v515_v12  ;;  %v282_v16 = vld [vmem:[%s1196_s22 + $0x348] sm:$0xff] }
 0x118   : > { %v517_v18 = vpop.f32.mrf.mxu1  ;;  %v740_v20 = vpop.f32.mrf.mxu3 }
 0x119   : > { %v741_v25 = vadd.f32 %v740_v20, %v628_v17  ;;  %v518_v28 = vadd.f32 %v517_v18, %v404_v15  ;;  %v283_v17 = vld [vmem:[%s1196_s22 + $0x350] sm:$0xff]  ;;  %v284_v20 = vld [vmem:[%s1196_s22 + $0x358] sm:$0xff] }
 0x11b   : > { %564 = vmatmul.f32.gmra.mxu1 %v266_v23  ;;  %677 = vmatmul.f32.gmra.mxu2 %v267_v24 }
 0x11c   : > { %868 = vmatmul.f32.gmra.mxu0 %v741_v25 }
 0x11d   : > { %790 = vmatmul.f32.gmra.mxu3 %v268_v26 }
 0x11e   : > { %v630_v31 = vpop.f32.mrf.mxu2 }
 0x11f   : > { %v631_v32 = vadd.f32 %v630_v31, %v518_v28  ;;  %v286_v28 = vld [vmem:[%s1196_s22 + $0x368] sm:$0xff]  ;;  %v287_v31 = vld [vmem:[%s1196_s22 + $0x370] sm:$0xff] }
 0x120   : > { %v520_v34 = vpop.f32.mrf.mxu1  ;;  %v743_v36 = vpop.f32.mrf.mxu3 }
 0x121   : > { %v744_v41 = vadd.f32 %v743_v36, %v631_v32  ;;  %v521_v46 = vadd.f32 %v520_v34, %v407_v33  ;;  %v288_v33 = vld [vmem:[%s1196_s22 + $0x378] sm:$0xff] }
 0x123   : > { %567 = vmatmul.f32.gmra.mxu1 %v270_v39  ;;  %680 = vmatmul.f32.gmra.mxu2 %v271_v40 }
 0x124   : > { %871 = vmatmul.f32.gmra.mxu0 %v744_v41  ;;  %v290_v41 = vld [vmem:[%s1196_s22 + $0x388] sm:$0xff] }
 0x125   : > { %793 = vmatmul.f32.gmra.mxu3 %v272_v45  ;;  %v291_v45 = vld [vmem:[%s1196_s22 + $0x390] sm:$0xff] }
 0x126   : > { %v633_v47 = vpop.f32.mrf.mxu2 }
 0x127   : > { %v634_v48 = vadd.f32 %v633_v47, %v521_v46  ;;  %v292_v47 = vld [vmem:[%s1196_s22 + $0x398] sm:$0xff] }
 0x128   : > { %v523_v52 = vpop.f32.mrf.mxu1  ;;  %v746_v53 = vpop.f32.mrf.mxu3 }
 0x129   : > { %v747_v58 = vadd.f32 %v746_v53, %v634_v48  ;;  %v524_v60 = vadd.f32 %v523_v52, %v1419_v62 }
 0x12b   : > { %570 = vmatmul.f32.gmra.mxu1 %v274_v54  ;;  %683 = vmatmul.f32.gmra.mxu2 %v275_v55  ;;  %v294_v55 = vld [vmem:[%s1196_s22 + $0x3a8] sm:$0xff] }
 0x12c   : > { %874 = vmatmul.f32.gmra.mxu0 %v747_v58  ;;  %v295_v58 = vld [vmem:[%s1196_s22 + $0x3b0] sm:$0xff] }
 0x12d   : > { %796 = vmatmul.f32.gmra.mxu3 %v276_v59 }
 0x12e   : > { %v636_v61 = vpop.f32.mrf.mxu2 }
 0x12f   : > { %v637_v63 = vadd.f32 %v636_v61, %v524_v60  ;;  %v296_v60 = vld [vmem:[%s1196_s22 + $0x3b8] sm:$0xff] }
 0x130   : > { %v526_v0 = vpop.f32.mrf.mxu1  ;;  %v749_v1 = vpop.f32.mrf.mxu3 }
 0x131   : > { %v750_v7 = vadd.f32 %v749_v1, %v637_v63  ;;  %v527_v9 = vadd.f32 %v526_v0, %v1432_v5 }
 0x133   : > { %573 = vmatmul.f32.gmra.mxu1 %v278_v2  ;;  %686 = vmatmul.f32.gmra.mxu2 %v279_v4  ;;  %v298_v2 = vld [vmem:[%s1196_s22 + $0x3c8] sm:$0xff]  ;;  %v299_v4 = vld [vmem:[%s1196_s22 + $0x3d0] sm:$0xff] }
 0x134   : > { %877 = vmatmul.f32.gmra.mxu0 %v750_v7 }
 0x135   : > { %799 = vmatmul.f32.gmra.mxu3 %v280_v8  ;;  %v300_v8 = vld [vmem:[%s1196_s22 + $0x3d8] sm:$0xff] }
 0x136   : > { %v639_v10 = vpop.f32.mrf.mxu2 }
 0x137   : > { %v640_v62 = vadd.f32 %v639_v10, %v527_v9 }
 0x138   : > { %v529_v12 = vpop.f32.mrf.mxu1  ;;  %v752_v15 = vpop.f32.mrf.mxu3 }
 0x139   : > { %v753_v18 = vadd.f32 %v752_v15, %v640_v62  ;;  %v530_v23 = vadd.f32 %v529_v12, %v1447_v13  ;;  %v302_v15 = vld [vmem:[%s1196_s22 + $0x3e8] sm:$0xff] }
 0x13b   : > { %576 = vmatmul.f32.gmra.mxu1 %v282_v16  ;;  %689 = vmatmul.f32.gmra.mxu2 %v283_v17  ;;  %v303_v16 = vld [vmem:[%s1196_s22 + $0x3f0] sm:$0xff] }
 0x13c   : > { %880 = vmatmul.f32.gmra.mxu0 %v753_v18  ;;  %v304_v18 = vld [vmem:[%s1196_s22 + $0x3f8] sm:$0xff]  ;;  %s1582_s22 = scalar_lea.vmem %s1637_s3, %s1047_s7 }
 0x13d   : > { %802 = vmatmul.f32.gmra.mxu3 %v284_v20 }
 0x13e   : > { %v642_v24 = vpop.f32.mrf.mxu2 }
 0x13f   : > { %v643_v5 = vadd.f32 %v642_v24, %v530_v23 }
 0x140   : > { %v532_v25 = vpop.f32.mrf.mxu1  ;;  %v755_v26 = vpop.f32.mrf.mxu3 }
 0x141   : > { %v756_v32 = vadd.f32 %v755_v26, %v643_v5  ;;  %v533_v34 = vadd.f32 %v532_v25, %v1462_v21 }
 0x143   : > { %579 = vmatmul.f32.gmra.mxu1 %v286_v28  ;;  %692 = vmatmul.f32.gmra.mxu2 %v287_v31 }
 0x144   : > { %883 = vmatmul.f32.gmra.mxu0 %v756_v32 }
 0x145   : > { %805 = vmatmul.f32.gmra.mxu3 %v288_v33 }
 0x146   : > { %v645_v36 = vpop.f32.mrf.mxu2 }
 0x147   : > { %v646_v13 = vadd.f32 %v645_v36, %v533_v34 }
 0x148   : > { %v535_v39 = vpop.f32.mrf.mxu1  ;;  %v758_v40 = vpop.f32.mrf.mxu3 }
 0x149   : > { %v759_v46 = vadd.f32 %v758_v40, %v646_v13  ;;  %v536_v48 = vadd.f32 %v535_v39, %v1477_v29 }
 0x14b   : > { %582 = vmatmul.f32.gmra.mxu1 %v290_v41  ;;  %695 = vmatmul.f32.gmra.mxu2 %v291_v45 }
 0x14c   : > { %886 = vmatmul.f32.gmra.mxu0 %v759_v46 }
 0x14d   : > { %808 = vmatmul.f32.gmra.mxu3 %v292_v47 }
 0x14e   : > { %v648_v52 = vpop.f32.mrf.mxu2 }
 0x14f   : > { %v649_v21 = vadd.f32 %v648_v52, %v536_v48 }
 0x150   : > { %v538_v53 = vpop.f32.mrf.mxu1  ;;  %v761_v54 = vpop.f32.mrf.mxu3 }
 0x151   : > { %v762_v59 = vadd.f32 %v761_v54, %v649_v21  ;;  %v539_v61 = vadd.f32 %v538_v53, %v1492_v37 }
 0x153   : > { %585 = vmatmul.f32.gmra.mxu1 %v294_v55  ;;  %698 = vmatmul.f32.gmra.mxu2 %v295_v58 }
 0x154   : > { %889 = vmatmul.f32.gmra.mxu0 %v762_v59 }
 0x155   : > { %811 = vmatmul.f32.gmra.mxu3 %v296_v60 }
 0x156   : > { %v651_v63 = vpop.f32.mrf.mxu2 }
 0x157   : > { %v652_v29 = vadd.f32 %v651_v63, %v539_v61 }
 0x158   : > { %v541_v0 = vpop.f32.mrf.mxu1  ;;  %v764_v1 = vpop.f32.mrf.mxu3 }
 0x159   : > { %v765_v7 = vadd.f32 %v764_v1, %v652_v29  ;;  %v542_v9 = vadd.f32 %v541_v0, %v1501_v43 }
 0x15b   : > { %588 = vmatmul.f32.gmra.mxu1 %v298_v2  ;;  %701 = vmatmul.f32.gmra.mxu2 %v299_v4 }
 0x15c   : > { %892 = vmatmul.f32.gmra.mxu0 %v765_v7 }
 0x15d   : > { %814 = vmatmul.f32.gmra.mxu3 %v300_v8 }
 0x15e   : > { %v654_v10 = vpop.f32.mrf.mxu2 }
 0x15f   : > { %v655_v37 = vadd.f32 %v654_v10, %v542_v9 }
 0x160   : > { %v544_v62 = vpop.f32.mrf.mxu1  ;;  %v767_v12 = vpop.f32.mrf.mxu3 }
 0x161   : > { %v768_v17 = vadd.f32 %v767_v12, %v655_v37  ;;  %v545_v20 = vadd.f32 %v544_v62, %v1510_v50 }
 0x163   : > { %591 = vmatmul.f32.gmra.mxu1 %v302_v15  ;;  %704 = vmatmul.f32.gmra.mxu2 %v303_v16 }
 0x164   : > { %895 = vmatmul.f32.gmra.mxu0 %v768_v17 }
 0x165   : > { %817 = vmatmul.f32.gmra.mxu3 %v304_v18 }
 0x166   : > { %v657_v23 = vpop.f32.mrf.mxu2 }
 0x167   : > { %v658_v24 = vadd.f32 %v657_v23, %v545_v20 }
 0x168   : > { %v547_v5 = vpop.f32.mrf.mxu1  ;;  %v770_v43 = vpop.f32.mrf.mxu3 }
 0x169   : > { %v771_v25 = vadd.f32 %v770_v43, %v658_v24  ;;  %v548_v26 = vadd.f32 %v547_v5, %v1427_v3 }
 0x16c   : > { %898 = vmatmul.f32.gmra.mxu0 %v771_v25 }
 0x16e   : > { %v660_v28 = vpop.f32.mrf.mxu2 }
 0x16f   : > { %v661_v31 = vadd.f32 %v660_v28, %v548_v26 }
 0x170   : > { %v550_v50 = vpop.f32.mrf.mxu1  ;;  %v773_v32 = vpop.f32.mrf.mxu3 }
 0x171   : > { %v774_v33 = vadd.f32 %v773_v32, %v661_v31  ;;  %v854_v34 = vpop.f32.mrf.mxu0  ;;  %v551_v36 = vadd.f32 %v550_v50, %v1442_v11 }
 0x172   : > { %950 = vst [vmem:[%s1582_s22] sm:$0xff] %v854_v34 }
 0x174   : > { %901 = vmatmul.f32.gmra.mxu0 %v774_v33 }
 0x176   : > { %v663_v13 = vpop.f32.mrf.mxu2 }
 0x177   : > { %v664_v3 = vadd.f32 %v663_v13, %v551_v36 }
 0x178   : > { %v553_v39 = vpop.f32.mrf.mxu1  ;;  %v776_v40 = vpop.f32.mrf.mxu3 }
 0x179   : > { %v777_v41 = vadd.f32 %v776_v40, %v664_v3  ;;  %v857_v45 = vpop.f32.mrf.mxu0  ;;  %v554_v46 = vadd.f32 %v553_v39, %v1457_v19 }
 0x17a   : > { %951 = vst [vmem:[%s1582_s22 + $0x8] sm:$0xff] %v857_v45 }
 0x17c   : > { %904 = vmatmul.f32.gmra.mxu0 %v777_v41 }
 0x17e   : > { %v666_v47 = vpop.f32.mrf.mxu2 }
 0x17f   : > { %v667_v48 = vadd.f32 %v666_v47, %v554_v46 }
 0x180   : > { %v556_v52 = vpop.f32.mrf.mxu1  ;;  %v779_v21 = vpop.f32.mrf.mxu3 }
 0x181   : > { %v780_v53 = vadd.f32 %v779_v21, %v667_v48  ;;  %v860_v54 = vpop.f32.mrf.mxu0  ;;  %v557_v11 = vadd.f32 %v556_v52, %v1472_v27 }
 0x182   : > { %952 = vst [vmem:[%s1582_s22 + $0x10] sm:$0xff] %v860_v54 }
 0x184   : > { %907 = vmatmul.f32.gmra.mxu0 %v780_v53 }
 0x186   : > { %v669_v55 = vpop.f32.mrf.mxu2 }
 0x187   : > { %v670_v58 = vadd.f32 %v669_v55, %v557_v11 }
 0x188   : > { %v559_v59 = vpop.f32.mrf.mxu1  ;;  %v782_v60 = vpop.f32.mrf.mxu3 }
 0x189   : > { %v783_v61 = vadd.f32 %v782_v60, %v670_v58  ;;  %v863_v63 = vpop.f32.mrf.mxu0  ;;  %v560_v19 = vadd.f32 %v559_v59, %v1487_v35 }
 0x18a   : > { %953 = vst [vmem:[%s1582_s22 + $0x18] sm:$0xff] %v863_v63 }
 0x18c   : > { %910 = vmatmul.f32.gmra.mxu0 %v783_v61 }
 0x18e   : > { %v672_v29 = vpop.f32.mrf.mxu2 }
 0x18f   : > { %v673_v0 = vadd.f32 %v672_v29, %v560_v19 }
 0x190   : > { %v562_v1 = vpop.f32.mrf.mxu1  ;;  %v785_v2 = vpop.f32.mrf.mxu3 }
 0x191   : > { %v786_v4 = vadd.f32 %v785_v2, %v673_v0  ;;  %v866_v7 = vpop.f32.mrf.mxu0  ;;  %v563_v27 = vadd.f32 %v562_v1, %v1499_v42 }
 0x192   : > { %954 = vst [vmem:[%s1582_s22 + $0x20] sm:$0xff] %v866_v7 }
 0x194   : > { %913 = vmatmul.f32.gmra.mxu0 %v786_v4 }
 0x196   : > { %v675_v8 = vpop.f32.mrf.mxu2 }
 0x197   : > { %v676_v9 = vadd.f32 %v675_v8, %v563_v27 }
 0x198   : > { %v565_v10 = vpop.f32.mrf.mxu1  ;;  %v788_v37 = vpop.f32.mrf.mxu3 }
 0x199   : > { %v789_v62 = vadd.f32 %v788_v37, %v676_v9  ;;  %v869_v12 = vpop.f32.mrf.mxu0  ;;  %v566_v35 = vadd.f32 %v565_v10, %v1508_v49 }
 0x19a   : > { %955 = vst [vmem:[%s1582_s22 + $0x28] sm:$0xff] %v869_v12 }
 0x19c   : > { %916 = vmatmul.f32.gmra.mxu0 %v789_v62 }
 0x19e   : > { %v678_v15 = vpop.f32.mrf.mxu2 }
 0x19f   : > { %v679_v16 = vadd.f32 %v678_v15, %v566_v35 }
 0x1a0   : > { %v568_v17 = vpop.f32.mrf.mxu1  ;;  %v791_v18 = vpop.f32.mrf.mxu3 }
 0x1a1   : > { %v792_v20 = vadd.f32 %v791_v18, %v679_v16  ;;  %v872_v23 = vpop.f32.mrf.mxu0  ;;  %v569_v42 = vadd.f32 %v568_v17, %v1517_v56 }
 0x1a2   : > { %956 = vst [vmem:[%s1582_s22 + $0x30] sm:$0xff] %v872_v23 }
 0x1a4   : > { %919 = vmatmul.f32.gmra.mxu0 %v792_v20 }
 0x1a6   : > { %v681_v24 = vpop.f32.mrf.mxu2 }
 0x1a7   : > { %v682_v5 = vadd.f32 %v681_v24, %v569_v42 }
 0x1a8   : > { %v571_v43 = vpop.f32.mrf.mxu1  ;;  %v794_v25 = vpop.f32.mrf.mxu3 }
 0x1a9   : > { %v795_v26 = vadd.f32 %v794_v25, %v682_v5  ;;  %v875_v28 = vpop.f32.mrf.mxu0  ;;  %v572_v49 = vadd.f32 %v571_v43, %v1434_v6 }
 0x1aa   : > { %957 = vst [vmem:[%s1582_s22 + $0x38] sm:$0xff] %v875_v28 }
 0x1ac   : > { %922 = vmatmul.f32.gmra.mxu0 %v795_v26 }
 0x1ae   : > { %v684_v31 = vpop.f32.mrf.mxu2 }
 0x1af   : > { %v685_v50 = vadd.f32 %v684_v31, %v572_v49 }
 0x1b0   : > { %v574_v32 = vpop.f32.mrf.mxu1  ;;  %v797_v33 = vpop.f32.mrf.mxu3 }
 0x1b1   : > { %v798_v34 = vadd.f32 %v797_v33, %v685_v50  ;;  %v878_v36 = vpop.f32.mrf.mxu0  ;;  %v575_v56 = vadd.f32 %v574_v32, %v1449_v14 }
 0x1b2   : > { %958 = vst [vmem:[%s1582_s22 + $0x40] sm:$0xff] %v878_v36 }
 0x1b4   : > { %925 = vmatmul.f32.gmra.mxu0 %v798_v34 }
 0x1b6   : > { %v687_v13 = vpop.f32.mrf.mxu2 }
 0x1b7   : > { %v688_v3 = vadd.f32 %v687_v13, %v575_v56 }
 0x1b8   : > { %v577_v39 = vpop.f32.mrf.mxu1  ;;  %v800_v40 = vpop.f32.mrf.mxu3 }
 0x1b9   : > { %v801_v41 = vadd.f32 %v800_v40, %v688_v3  ;;  %v881_v45 = vpop.f32.mrf.mxu0  ;;  %v578_v6 = vadd.f32 %v577_v39, %v1464_v22 }
 0x1ba   : > { %959 = vst [vmem:[%s1582_s22 + $0x48] sm:$0xff] %v881_v45 }
 0x1bc   : > { %928 = vmatmul.f32.gmra.mxu0 %v801_v41 }
 0x1be   : > { %v690_v46 = vpop.f32.mrf.mxu2 }
 0x1bf   : > { %v691_v47 = vadd.f32 %v690_v46, %v578_v6 }
 0x1c0   : > { %v580_v48 = vpop.f32.mrf.mxu1  ;;  %v803_v52 = vpop.f32.mrf.mxu3 }
 0x1c1   : > { %v804_v21 = vadd.f32 %v803_v52, %v691_v47  ;;  %v884_v53 = vpop.f32.mrf.mxu0  ;;  %v581_v14 = vadd.f32 %v580_v48, %v1479_v30 }
 0x1c2   : > { %960 = vst [vmem:[%s1582_s22 + $0x50] sm:$0xff] %v884_v53 }
 0x1c4   : > { %931 = vmatmul.f32.gmra.mxu0 %v804_v21 }
 0x1c6   : > { %v693_v54 = vpop.f32.mrf.mxu2 }
 0x1c7   : > { %v694_v11 = vadd.f32 %v693_v54, %v581_v14 }
 0x1c8   : > { %v583_v55 = vpop.f32.mrf.mxu1  ;;  %v806_v58 = vpop.f32.mrf.mxu3 }
 0x1c9   : > { %v807_v59 = vadd.f32 %v806_v58, %v694_v11  ;;  %v887_v60 = vpop.f32.mrf.mxu0  ;;  %v584_v22 = vadd.f32 %v583_v55, %v1494_v38 }
 0x1ca   : > { %961 = vst [vmem:[%s1582_s22 + $0x58] sm:$0xff] %v887_v60 }
 0x1cc   : > { %934 = vmatmul.f32.gmra.mxu0 %v807_v59 }
 0x1ce   : > { %v696_v61 = vpop.f32.mrf.mxu2 }
 0x1cf   : > { %v697_v63 = vadd.f32 %v696_v61, %v584_v22 }
 0x1d0   : > { %v586_v19 = vpop.f32.mrf.mxu1  ;;  %v809_v29 = vpop.f32.mrf.mxu3 }
 0x1d1   : > { %v810_v0 = vadd.f32 %v809_v29, %v697_v63  ;;  %v890_v1 = vpop.f32.mrf.mxu0  ;;  %v587_v30 = vadd.f32 %v586_v19, %v1503_v44 }
 0x1d2   : > { %962 = vst [vmem:[%s1582_s22 + $0x60] sm:$0xff] %v890_v1 }
 0x1d4   : > { %937 = vmatmul.f32.gmra.mxu0 %v810_v0 }
 0x1d6   : > { %v699_v2 = vpop.f32.mrf.mxu2 }
 0x1d7   : > { %v700_v4 = vadd.f32 %v699_v2, %v587_v30 }
 0x1d8   : > { %v589_v7 = vpop.f32.mrf.mxu1  ;;  %v812_v27 = vpop.f32.mrf.mxu3 }
 0x1d9   : > { %v813_v8 = vadd.f32 %v812_v27, %v700_v4  ;;  %v893_v9 = vpop.f32.mrf.mxu0  ;;  %v590_v38 = vadd.f32 %v589_v7, %v1512_v51 }
 0x1da   : > { %963 = vst [vmem:[%s1582_s22 + $0x68] sm:$0xff] %v893_v9 }
 0x1dc   : > { %940 = vmatmul.f32.gmra.mxu0 %v813_v8 }
 0x1de   : > { %v702_v10 = vpop.f32.mrf.mxu2 }
 0x1df   : > { %v703_v37 = vadd.f32 %v702_v10, %v590_v38 }
 0x1e0   : > { %v815_v62 = vpop.f32.mrf.mxu3  ;;  %v592_v44 = vpop.f32.mrf.mxu1 }
 0x1e1   : > { %v816_v12 = vadd.f32 %v815_v62, %v703_v37  ;;  %v896_v35 = vpop.f32.mrf.mxu0  ;;  %v593_v15 = vadd.f32 %v592_v44, %v1519_v57 }
 0x1e2   : > { %964 = vst [vmem:[%s1582_s22 + $0x70] sm:$0xff] %v896_v35 }
 0x1e4   : > { %943 = vmatmul.f32.gmra.mxu0 %v816_v12 }
 0x1e6   : > { %v705_v16 = vpop.f32.mrf.mxu2 }
 0x1e7   : > { %v706_v17 = vadd.f32 %v705_v16, %v593_v15 }
 0x1e8   : > { %v818_v18 = vpop.f32.mrf.mxu3 }
 0x1e9   : > { %v819_v51 = vadd.f32 %v818_v18, %v706_v17  ;;  %v899_v20 = vpop.f32.mrf.mxu0 }
 0x1ea   : > { %965 = vst [vmem:[%s1582_s22 + $0x78] sm:$0xff] %v899_v20 }
 0x1ec   : > { %946 = vmatmul.f32.gmra.mxu0 %v819_v51 }
 0x1f1   : > { %v902_v23 = vpop.f32.mrf.mxu0 }
 0x1f2   : > { %966 = vst [vmem:[%s1582_s22 + $0x80] sm:$0xff] %v902_v23 }
 0x1f9   : > { %v905_v42 = vpop.f32.mrf.mxu0 }
 0x1fa   : > { %967 = vst [vmem:[%s1582_s22 + $0x88] sm:$0xff] %v905_v42 }
 0x201   : > { %v908_v24 = vpop.f32.mrf.mxu0 }
 0x202   : > { %968 = vst [vmem:[%s1582_s22 + $0x90] sm:$0xff] %v908_v24 }
 0x209   : > { %v911_v57 = vpop.f32.mrf.mxu0 }
 0x20a   : > { %969 = vst [vmem:[%s1582_s22 + $0x98] sm:$0xff] %v911_v57 }
 0x211   : > { %v914_v5 = vpop.f32.mrf.mxu0 }
 0x212   : > { %970 = vst [vmem:[%s1582_s22 + $0xa0] sm:$0xff] %v914_v5 }
 0x219   : > { %v917_v43 = vpop.f32.mrf.mxu0 }
 0x21a   : > { %971 = vst [vmem:[%s1582_s22 + $0xa8] sm:$0xff] %v917_v43 }
 0x221   : > { %v920_v25 = vpop.f32.mrf.mxu0 }
 0x222   : > { %972 = vst [vmem:[%s1582_s22 + $0xb0] sm:$0xff] %v920_v25 }
 0x229   : > { %v923_v26 = vpop.f32.mrf.mxu0 }
 0x22a   : > { %973 = vst [vmem:[%s1582_s22 + $0xb8] sm:$0xff] %v923_v26 }
 0x231   : > { %v926_v28 = vpop.f32.mrf.mxu0 }
 0x232   : > { %974 = vst [vmem:[%s1582_s22 + $0xc0] sm:$0xff] %v926_v28 }
 0x239   : > { %v929_v49 = vpop.f32.mrf.mxu0 }
 0x23a   : > { %975 = vst [vmem:[%s1582_s22 + $0xc8] sm:$0xff] %v929_v49 }
 0x241   : > { %v932_v31 = vpop.f32.mrf.mxu0 }
 0x242   : > { %976 = vst [vmem:[%s1582_s22 + $0xd0] sm:$0xff] %v932_v31 }
 0x249   : > { %v935_v50 = vpop.f32.mrf.mxu0 }
 0x24a   : > { %977 = vst [vmem:[%s1582_s22 + $0xd8] sm:$0xff] %v935_v50 }
 0x251   : > { %v938_v32 = vpop.f32.mrf.mxu0 }
 0x252   : > { %978 = vst [vmem:[%s1582_s22 + $0xe0] sm:$0xff] %v938_v32 }
 0x259   : > { %v941_v33 = vpop.f32.mrf.mxu0 }
 0x25a   : > { %979 = vst [vmem:[%s1582_s22 + $0xe8] sm:$0xff] %v941_v33 }
 0x261   : > { %v944_v34 = vpop.f32.mrf.mxu0 }
 0x262   : > { %980 = vst [vmem:[%s1582_s22 + $0xf0] sm:$0xff] %v944_v34 }
 0x269   : > { %v947_v36 = vpop.f32.mrf.mxu0 }
 0x26a   : > { %981 = vst [vmem:[%s1582_s22 + $0xf8] sm:$0xff] %v947_v36 }
 0x26b PF: > { %s13_s12 = sadd.s32 1, %s1113_s12  }
 0x26c   : > { %p10_p4 = scmp.ge.s32.totalorder %s13_s12, 4  }
 0x26e   :  { %12 = sbr.rel (!%p10_p4) target bundleno = 1 (0x1), region = 62 }

</bundles_post_ra>
